<compile_context>
chip_gen: v5e
topology: v5e:2x2
jax: 0.10.0
libtpu: 0.0.40
codegen_flags: <defaults>
</compile_context>

<pallas_src>
import functools

import jax
import jax.numpy as jnp
from jax import lax
from jax.experimental import pallas as pl
from jax.experimental.pallas import tpu as pltpu  # noqa: F401  (TPU backend)

_LANES = 128  # lane width for the lane-dense output slab


def _dssm_kernel(h_ref, w_ref, b_ref, out_ref, *, inv_t, batch):
    # h_ref  : (2B, S, H) f32 stacked hidden states; tower1 = rows [0, B),
    #          tower2 = rows [B, 2B).
    # w_ref  : (H, H)  bf16 pooler dense weight in [in, out] layout.
    # b_ref  : (1, H)  f32 pooler dense bias.
    # out_ref: (B, 128) f32 lane-dense slab; every lane holds sigmoid(cos/t).
    #
    # CLS gather: static slice of the sublane-0 row of each (S, H) tile,
    # cast straight to bf16 -> one (2B, H) = (16, 128) bf16 vreg.
    cls = h_ref[:, 0, :].astype(jnp.bfloat16)                       # (2B, H)

    # Both towers through the MXU in one pass: bf16 x bf16 -> f32 accumulate.
    z = jnp.dot(cls, w_ref[...], preferred_element_type=jnp.float32)
    z = z + b_ref[...]                                              # (2B, H) f32

    # BertPooler nonlinearity (f32: v5e VPU/EUP have no bf16).
    v = jnp.tanh(z)
    v1 = v[:batch]                                                  # (B, H)
    v2 = v[batch:]                                                  # (B, H)

    # torch.cosine_similarity(dim=1, eps=1e-8): per-norm clamp at eps.
    # (Per-norm vs product clamp only differ when norms ~ eps, impossible
    # after tanh of a dense projection.)
    dot = jnp.sum(v1 * v2, axis=1, keepdims=True)                   # (B, 1)
    n1sq = jnp.sum(v1 * v1, axis=1, keepdims=True)
    n2sq = jnp.sum(v2 * v2, axis=1, keepdims=True)
    eps2 = jnp.float32(1e-16)                                       # eps^2
    sim = (dot
           * lax.rsqrt(jnp.maximum(n1sq, eps2))                     # EUP rsqrt,
           * lax.rsqrt(jnp.maximum(n2sq, eps2)))                    # no f32 div/sqrt

    y = jax.nn.sigmoid(sim * jnp.float32(inv_t))                    # (B, 1)

    # Lane-dense store: full 128-lane width -> unmasked vst.
    out_ref[...] = jnp.broadcast_to(y, out_ref.shape)


def _dssm_head(hidden_stacked, w_pool_bf16, b_pool, t):
    """Fused DSSM head over stacked towers.

    hidden_stacked : [2B, S, H] f32 last-hidden-states (tower1 rows first).
    w_pool_bf16    : [H, H] bf16 pooler weight in [in, out] layout
                     (i.e. torch_pooler.dense.weight.T, pre-cast to bf16).
    b_pool         : [H] f32 pooler bias.
    Returns a (B, 128) f32 slab whose every lane is sigmoid(cos/t).
    """
    B2, S, H = hidden_stacked.shape
    B = B2 // 2
    b2d = b_pool.reshape(1, H)  # metadata-only reshape

    kernel = functools.partial(_dssm_kernel, inv_t=1.0 / float(t), batch=B)

    return pl.pallas_call(
        kernel,
        out_shape=jax.ShapeDtypeStruct((B, _LANES), jnp.float32),
        in_specs=[
            # Full-array block (2B, S, H): last two dims (8, 128) are
            # tile-aligned -> one contiguous 64 KiB DMA for both towers.
            pl.BlockSpec((B2, S, H), lambda: (0, 0, 0)),
            pl.BlockSpec((H, H), lambda: (0, 0)),        # bf16 weight, 32 KiB
            pl.BlockSpec((1, H), lambda: (0, 0)),
        ],
        out_specs=pl.BlockSpec((B, _LANES), lambda: (0, 0)),
    )(hidden_stacked, w_pool_bf16, b2d)


@functools.partial(jax.jit, static_argnames=("t",))
def dssm_forward(hidden1, hidden2, w_pool_bf16, b_pool, t):
    """Two-tower API matching the PyTorch module.

    In production the encoder should run on the concatenated 2B batch so the
    concat below disappears; here it is a tiny fused op inside the same jit,
    as is the final [:, 0] slice of the lane-dense slab.
    """
    h = jnp.concatenate([hidden1, hidden2], axis=0)   # (2B, S, H)
    slab = _dssm_head(h, w_pool_bf16, b_pool, t)      # (B, 128)
    return slab[:, 0]                                 # (B,)


def _reference(hidden1, hidden2, w_pool_f32, b_pool, t):
    """Pure-f32 JAX reference matching the PyTorch module semantics."""
    cls1 = hidden1[:, 0, :]
    cls2 = hidden2[:, 0, :]
    v1 = jnp.tanh(cls1 @ w_pool_f32 + b_pool)
    v2 = jnp.tanh(cls2 @ w_pool_f32 + b_pool)
    eps = 1e-8
    dot = jnp.sum(v1 * v2, axis=1)
    n1 = jnp.maximum(jnp.linalg.norm(v1, axis=1), eps)
    n2 = jnp.maximum(jnp.linalg.norm(v2, axis=1), eps)
    sim = dot / (n1 * n2)
    return jax.nn.sigmoid(sim / t)


if __name__ == "__main__":
    B, S, H = 8, 8, 128
    t = 0.05  # DSSM temperature

    key = jax.random.PRNGKey(0)
    k1, k2, kw, kb = jax.random.split(key, 4)

    # Synthetic "BERT last hidden states" for the two towers.
    hidden1 = jax.random.normal(k1, (B, S, H), dtype=jnp.float32)
    hidden2 = jax.random.normal(k2, (B, S, H), dtype=jnp.float32)

    # Pooler parameters (BertPooler: Linear(H, H) + tanh). w_pool is [in, out]
    # layout, i.e. the transpose of nn.Linear.weight.
    w_pool = jax.random.normal(kw, (H, H), dtype=jnp.float32) / jnp.sqrt(
        jnp.float32(H))
    b_pool = jax.random.normal(kb, (H,), dtype=jnp.float32) * 0.01

    # One-time weight preprocessing: pre-cast W to bf16 outside the kernel.
    w_pool_bf16 = w_pool.astype(jnp.bfloat16)

    y = dssm_forward(hidden1, hidden2, w_pool_bf16, b_pool, t)
    y = jax.block_until_ready(y)

    y_ref = _reference(hidden1, hidden2, w_pool, b_pool, t)
    assert y.shape == (B,)
    # Tolerance accounts for bf16 MXU operands (f32 accumulation) vs the
    # pure-f32 reference, amplified by 1/t = 20 ahead of the sigmoid.
    assert jnp.allclose(y, y_ref, atol=2e-2, rtol=2e-2), (y, y_ref)

    print("KERNEL_OK")
</pallas_src>

<mosaic_0001>
module attributes {stable_mosaic.version = 11 : i64} {
  func.func @_dssm_kernel(%arg0: memref<16x8x128xf32, #tpu.memory_space<vmem>>, %arg1: memref<128x128xbf16, #tpu.memory_space<vmem>>, %arg2: memref<1x128xf32, #tpu.memory_space<vmem>>, %arg3: memref<8x128xf32, #tpu.memory_space<vmem>>) attributes {dimension_semantics = [], scalar_prefetch = 0 : i64, scratch_operands = 0 : i64, tpu.core_type = #tpu.core_type<tc>} {
    %c0 = arith.constant 0 : index
    %c0_0 = arith.constant 0 : index
    %c0_1 = arith.constant 0 : index
    %0 = vector.load %arg0[%c0, %c0_0, %c0_1] : memref<16x8x128xf32, #tpu.memory_space<vmem>>, vector<16x1x128xf32>
    %1 = vector.shape_cast %0 : vector<16x1x128xf32> to vector<16x128xf32>
    %2 = arith.truncf %1 : vector<16x128xf32> to vector<16x128xbf16>
    %c0_2 = arith.constant 0 : index
    %c0_3 = arith.constant 0 : index
    %3 = vector.load %arg1[%c0_2, %c0_3] : memref<128x128xbf16, #tpu.memory_space<vmem>>, vector<128x128xbf16>
    %cst = arith.constant dense<0.000000e+00> : vector<16x128xf32>
    %4 = tpu.matmul %2, %3, %cst {dimension_numbers = #tpu.dot_dimension_numbers<[1], [0], [0], [1], [0, 0, 1, 1], [], []>} : vector<16x128xbf16>, vector<128x128xbf16>, vector<16x128xf32> -> vector<16x128xf32>
    %c0_4 = arith.constant 0 : index
    %c0_5 = arith.constant 0 : index
    %5 = vector.load %arg2[%c0_4, %c0_5] : memref<1x128xf32, #tpu.memory_space<vmem>>, vector<1x128xf32>
    %6 = vector.broadcast %5 : vector<1x128xf32> to vector<16x128xf32>
    %7 = arith.addf %4, %6 : vector<16x128xf32>
    %8 = math.tanh %7 : vector<16x128xf32>
    %9 = vector.extract_strided_slice %8 {offsets = [0, 0], sizes = [8, 128], strides = [1, 1]} : vector<16x128xf32> to vector<8x128xf32>
    %10 = vector.extract_strided_slice %8 {offsets = [8, 0], sizes = [8, 128], strides = [1, 1]} : vector<16x128xf32> to vector<8x128xf32>
    %11 = arith.mulf %9, %10 : vector<8x128xf32>
    %cst_6 = arith.constant dense<0.000000e+00> : vector<8xf32>
    %12 = vector.multi_reduction <add>, %11, %cst_6 [1] : vector<8x128xf32> to vector<8xf32>
    %13 = vector.shape_cast %12 : vector<8xf32> to vector<8x1xf32>
    %14 = arith.mulf %9, %9 : vector<8x128xf32>
    %cst_7 = arith.constant dense<0.000000e+00> : vector<8xf32>
    %15 = vector.multi_reduction <add>, %14, %cst_7 [1] : vector<8x128xf32> to vector<8xf32>
    %16 = vector.shape_cast %15 : vector<8xf32> to vector<8x1xf32>
    %17 = arith.mulf %10, %10 : vector<8x128xf32>
    %cst_8 = arith.constant dense<0.000000e+00> : vector<8xf32>
    %18 = vector.multi_reduction <add>, %17, %cst_8 [1] : vector<8x128xf32> to vector<8xf32>
    %19 = vector.shape_cast %18 : vector<8xf32> to vector<8x1xf32>
    %cst_9 = arith.constant 1.000000e-16 : f32
    %20 = vector.broadcast %cst_9 : f32 to vector<8x1xf32>
    %21 = arith.maximumf %16, %20 : vector<8x1xf32>
    %22 = math.rsqrt %21 : vector<8x1xf32>
    %23 = arith.mulf %13, %22 : vector<8x1xf32>
    %cst_10 = arith.constant 1.000000e-16 : f32
    %24 = vector.broadcast %cst_10 : f32 to vector<8x1xf32>
    %25 = arith.maximumf %19, %24 : vector<8x1xf32>
    %26 = math.rsqrt %25 : vector<8x1xf32>
    %27 = arith.mulf %23, %26 : vector<8x1xf32>
    %cst_11 = arith.constant 2.000000e+01 : f32
    %28 = vector.broadcast %cst_11 : f32 to vector<8x1xf32>
    %29 = arith.mulf %27, %28 : vector<8x1xf32>
    %30 = arith.negf %29 : vector<8x1xf32>
    %31 = math.exp %30 : vector<8x1xf32>
    %cst_12 = arith.constant 1.000000e+00 : f32
    %32 = vector.broadcast %cst_12 : f32 to vector<8x1xf32>
    %33 = arith.addf %32, %31 : vector<8x1xf32>
    %34 = arith.divf %32, %33 : vector<8x1xf32>
    %35 = vector.shape_cast %34 : vector<8x1xf32> to vector<8x1xf32>
    %36 = vector.broadcast %35 : vector<8x1xf32> to vector<8x128xf32>
    %c0_13 = arith.constant 0 : index
    %c0_14 = arith.constant 0 : index
    %37 = vector.load %arg3[%c0_13, %c0_14] : memref<8x128xf32, #tpu.memory_space<vmem>>, vector<8x128xf32>
    tpu.vector_store %arg3[%c0_13, %c0_14], %36 {strides = array<i32>} : memref<8x128xf32, #tpu.memory_space<vmem>>, vector<8x128xf32>,
    return
  }
}

</mosaic_0001>

<bundles_post_ra>
// kernel: dssm_forward.1
= control target key start
LH: loop header
LB: loop body
LE: loop exit
PB: predicated region body
PF: predicated region fallthrough
CT: control target
= control target key end

     0   :  { %vm99_vm0 = vcmask 1041409   ;;  %vm102_vm1 = vcmask 1042434   ;;  %vm105_vm2 = vcmask 1043459   ;;  %vm108_vm3 = vcmask 1044484   ;;  %s417_s1 = inlined_call_operand.vmem [shape: bf16[128,128], index: 1, kind: input, shape index: {}]   ;;  %s418_s0 = inlined_call_operand.vmem [shape: f32[16,8,128], index: 0, kind: input, shape index: {}]   ;;  %s419_s2 = inlined_call_operand.vmem [shape: f32[1,128], index: 2, kind: input, shape index: {}]   ;;  %s420_s3 = inlined_call_operand.vmem [shape: f32[8,128], index: 3, kind: output, shape index: {}]  }
   0x1   :  { %v297_v0 = vld [vmem:[%s417_s1 + $0x38] sm:$0xff]  ;;  %v296_v1 = vld [vmem:[%s417_s1 + $0x30] sm:$0xff]  ;;  %v14_v2 = vld [vmem:[%s418_s0] sm:$0x1]  ;;  %vm111_vm4 = vcmask 1045509   ;;  %vm114_vm5 = vcmask 1046534  }
   0x2   :  { %183 = vmatpush.bf16.msra.mxu0 %v297_v0  ;;  %v15_v3 = vld [vmem:[%s418_s0 + $0x8] sm:$0x1]  ;;  %v16_v4 = vld [vmem:[%s418_s0 + $0x10] sm:$0x1]  ;;  %v17_v5 = vld [vmem:[%s418_s0 + $0x18] sm:$0x1]  ;;  %v30_v19 = vpack.c.bf16 %v14_v2, %v14_v2 }
   0x3   :  { %v295_v6 = vld [vmem:[%s417_s1 + $0x28] sm:$0xff]  ;;  %v18_v7 = vld [vmem:[%s418_s0 + $0x20] sm:$0x1]  ;;  %v31_v9 = vpack.c.bf16 %v15_v3, %v15_v3  ;;  %v32_v10 = vpack.c.bf16 %v16_v4, %v16_v4  ;;  %v33_v11 = vpack.c.bf16 %v17_v5, %v17_v5  ;;  %v20_v12 = vld [vmem:[%s418_s0 + $0x30] sm:$0x1]  ;;  %vm117_vm6 = vcmask 1047559  }
   0x4   :  { %v19_v8 = vld [vmem:[%s418_s0 + $0x28] sm:$0x1]  ;;  %v22_v13 = vld [vmem:[%s418_s0 + $0x40] sm:$0x1]  ;;  %v34_v15 = vpack.c.bf16 %v18_v7, %v18_v7  ;;  %v24_v16 = vld [vmem:[%s418_s0 + $0x50] sm:$0x1]  ;;  %v36_v32 = vpack.c.bf16 %v20_v12, %v20_v12  ;;  %v82_v37 = vunpack.c.l.b16 %v30_v19 }
   0x5   :  { %v23_v14 = vld [vmem:[%s418_s0 + $0x48] sm:$0x1]  ;;  %v25_v17 = vld [vmem:[%s418_s0 + $0x58] sm:$0x1]  ;;  %v26_v18 = vld [vmem:[%s418_s0 + $0x60] sm:$0x1]  ;;  %v35_v20 = vpack.c.bf16 %v19_v8, %v19_v8  ;;  %v38_v23 = vpack.c.bf16 %v22_v13, %v22_v13  ;;  %v40_v24 = vpack.c.bf16 %v24_v16, %v24_v16  ;;  %v83_v29 = vunpack.c.l.b16 %v31_v9 }
   0x6   :  { %184 = vmatpush.bf16.msra.mxu0 %v296_v1  ;;  %v39_v21 = vpack.c.bf16 %v23_v14, %v23_v14  ;;  %v27_v22 = vld [vmem:[%s418_s0 + $0x68] sm:$0x1]  ;;  %v41_v25 = vpack.c.bf16 %v25_v17, %v25_v17  ;;  %v42_v26 = vpack.c.bf16 %v26_v18, %v26_v18  ;;  %v28_v27 = vld [vmem:[%s418_s0 + $0x70] sm:$0x1]  ;;  %v84_v30 = vunpack.c.l.b16 %v32_v10  ;;  %v294_v34 = vld [vmem:[%s417_s1 + $0x20] sm:$0xff] }
   0x7   :  { %v43_v28 = vpack.c.bf16 %v27_v22, %v27_v22  ;;  %v85_v31 = vunpack.c.l.b16 %v33_v11  ;;  %v86_v33 = vunpack.c.l.b16 %v34_v15  ;;  %v21_v35 = vld [vmem:[%s418_s0 + $0x38] sm:$0x1]  ;;  %v92_v39 = vunpack.c.l.b16 %v40_v24  ;;  %v292_v4 = vld [vmem:[%s417_s1 + $0x10] sm:$0xff]  ;;  %v291_v12 = vld [vmem:[%s417_s1 + $0x8] sm:$0xff] }
   0x8   :  { %v29_v36 = vld [vmem:[%s418_s0 + $0x78] sm:$0x1]  ;;  %v91_v38 = vunpack.c.l.b16 %v39_v21  ;;  %v93_v40 = vunpack.c.l.b16 %v41_v25  ;;  %v44_v41 = vpack.c.bf16 %v28_v27, %v28_v27  ;;  %v87_v42 = vunpack.c.l.b16 %v35_v20  ;;  %v290_v17 = vld [vmem:[%s417_s1] sm:$0xff] }
   0x9   :  { %v90_v43 = vunpack.c.l.b16 %v38_v23  ;;  %v94_v44 = vunpack.c.l.b16 %v42_v26  ;;  %v95_v45 = vunpack.c.l.b16 %v43_v28  ;;  %v98_v46 = vrot.slane %v83_v29, 7  ;;  %v293_v53 = vld [vmem:[%s417_s1 + $0x18] sm:$0xff]  ;;  %v298_v21 = vld [vmem:[%s419_s2] ss:$0 sm:$0xff] }
   0xa   :  { %185 = vmatpush.bf16.msra.mxu0 %v295_v6  ;;  %v101_v47 = vrot.slane %v84_v30, 6  ;;  %v104_v48 = vrot.slane %v85_v31, 5  ;;  %v37_v49 = vpack.c.bf16 %v21_v35, %v21_v35  ;;  %v45_v50 = vpack.c.bf16 %v29_v36, %v29_v36 }
   0xb   :  { %v107_v51 = vrot.slane %v86_v33, 4  ;;  %v119_v52 = vrot.slane %v91_v38, 7  ;;  %v100_v54 = vsel %vm99_vm0, %v98_v46, %v82_v37  ;;  %v121_v55 = vrot.slane %v92_v39, 6 }
   0xc   :  { %v123_v56 = vrot.slane %v93_v40, 5  ;;  %v125_v57 = vrot.slane %v94_v44, 4  ;;  %v88_v58 = vunpack.c.l.b16 %v36_v32  ;;  %v96_v59 = vunpack.c.l.b16 %v44_v41 }
   0xd   :  { %v103_v60 = vsel %vm102_vm1, %v101_v47, %v100_v54  ;;  %v120_v61 = vsel %vm99_vm0, %v119_v52, %v90_v43  ;;  %v110_v63 = vrot.slane %v87_v42, 3  ;;  %v127_v1 = vrot.slane %v95_v45, 3 }
   0xe   :  { %186 = vmatpush.bf16.msra.mxu0 %v294_v34  ;;  %v106_v62 = vsel %vm105_vm2, %v104_v48, %v103_v60  ;;  %v122_v0 = vsel %vm102_vm1, %v121_v55, %v120_v61  ;;  %v89_v5 = vunpack.c.l.b16 %v37_v49  ;;  %v97_v6 = vunpack.c.l.b16 %v45_v50 }
   0xf   :  { %v109_v2 = vsel %vm108_vm3, %v107_v51, %v106_v62  ;;  %v124_v3 = vsel %vm105_vm2, %v123_v56, %v122_v0  ;;  %v113_v8 = vrot.slane %v88_v58, 2  ;;  %v129_v9 = vrot.slane %v96_v59, 2 }
  0x10   :  { %v126_v7 = vsel %vm108_vm3, %v125_v57, %v124_v3  ;;  %v112_v10 = vsel %vm111_vm4, %v110_v63, %v109_v2  ;;  %v116_v13 = vrot.slane %v89_v5, 1  ;;  %v131_v14 = vrot.slane %v97_v6, 1 }
  0x11   :  { %v128_v11 = vsel %vm111_vm4, %v127_v1, %v126_v7  ;;  %v115_v15 = vsel %vm114_vm5, %v113_v8, %v112_v10 }
  0x12   :  { %187 = vmatpush.bf16.msra.mxu0 %v293_v53  ;;  %v130_v16 = vsel %vm114_vm5, %v129_v9, %v128_v11  ;;  %v118_v18 = vsel %vm117_vm6, %v116_v13, %v115_v15 }
  0x13   :  { %v132_v19 = vsel %vm117_vm6, %v131_v14, %v130_v16 }
  0x14   :  { %v133_v20 = vpack.c.b16 %v132_v19, %v118_v18 }
  0x16   :  { %188 = vmatpush.bf16.msra.mxu0 %v292_v4 }
  0x1a   :  { %189 = vmatpush.bf16.msra.mxu0 %v291_v12 }
  0x1e   :  { %190 = vmatpush.bf16.msra.mxu0 %v290_v17 }
  0x21   :  { %191 = vmatmul.bf16.vlgmr.msra.gmra.mxu0 %v133_v20 }
  0x9e   :  { %v192_v22 = vpop.f32.mrf.mxu0 }
  0x9f   :  { %v193_v23 = vadd.f32 %v298_v21, %v192_v22 }
  0xa1   :  { %299 = vtanh.f32 %v193_v23 }
  0xa6   :  { %v194_v24 = vpop.f32.mrf.mxu0 }
  0xa7   :  { %v300_v25 = vpop.eup %299  ;;  %v195_v26 = vadd.f32 %v298_v21, %v194_v24 }
  0xa8   :  { %v202_v27 = vmul.f32 %v300_v25, %v300_v25 }
  0xa9   :  { %301 = vtanh.f32 %v195_v26 }
  0xaa   :  { %203 = vadd.xlane.f32.xlu0 %v202_v27 }
  0xaf   :  { %v302_v28 = vpop.eup %301 }
  0xb0   :  { %v205_v29 = vmul.f32 %v302_v28, %v302_v28  ;;  %v199_v30 = vmul.f32 %v302_v28, %v300_v25 }
  0xb2   :  { %206 = vadd.xlane.f32.xlu0 %v205_v29  ;;  %200 = vadd.xlane.f32.xlu1 %v199_v30 }
 0x11d   :  { %v204_v31 = vpop.xlane.xlu0 %203 }
 0x11e   :  { %v208_v32 = vmax.f32 %v204_v31, 1e-16 }
 0x120   :  { %303 = vrsqrt.f32 %v208_v32  ;;  %vm215_vm8 = vweird.f32 %v208_v32 }
 0x125   :  { %v207_v33 = vpop.xlane.xlu0 %206  ;;  %v201_v48 = vpop.xlane.xlu1 %200 }
 0x126   :  { %v304_v34 = vpop.eup %303  ;;  %v220_v35 = vmax.f32 %v207_v33, 1e-16 }
 0x127   :  { %v210_v36 = vmul.f32 %v304_v34, %v208_v32  ;;  %vm216_vm7 = vweird.f32 %v304_v34 }
 0x128   :  { %305 = vrsqrt.f32 %v220_v35  ;;  %vm217_vm9 = vmor %vm215_vm8, %vm216_vm7  ;;  %vm227_vm11 = vweird.f32 %v220_v35 }
 0x129   :  { %v211_v37 = vmul.f32 %v304_v34, %v210_v36 }
 0x12b   :  { %v212_v38 = vmul.f32 0.5, %v211_v37 }
 0x12d   :  { %v213_v39 = vsub.f32 1.5, %v212_v38 }
 0x12e   :  { %v306_v40 = vpop.eup %305 }
 0x12f   :  { %v222_v41 = vmul.f32 %v306_v40, %v220_v35  ;;  %v214_v43 = vmul.f32 %v304_v34, %v213_v39  ;;  %vm228_vm10 = vweird.f32 %v306_v40 }
 0x130   :  { %vm229_vm12 = vmor %vm227_vm11, %vm228_vm10 }
 0x131   :  { %v223_v42 = vmul.f32 %v306_v40, %v222_v41  ;;  %v218_v46 = vsel %vm217_vm9, %v304_v34, %v214_v43 }
 0x132   :  { %v219_v49 = vmul.f32 %v218_v46, %v201_v48 }
 0x133   :  { %v224_v44 = vmul.f32 0.5, %v223_v42 }
 0x135   :  { %v225_v45 = vsub.f32 1.5, %v224_v44 }
 0x137   :  { %v226_v47 = vmul.f32 %v306_v40, %v225_v45 }
 0x139   :  { %v230_v50 = vsel %vm229_vm12, %v306_v40, %v226_v47 }
 0x13a   :  { %v231_v51 = vmul.f32 %v230_v50, %v219_v49 }
 0x13c   :  { %v289_v52 = vmul.f32 -20.0, %v231_v51 }
 0x13e   :  { %v234_v53 = vmul.f32 1.442695, %v289_v52 }
 0x140   :  { %307 = vpow2.f32 %v234_v53 }
 0x146   :  { %v308_v54 = vpop.eup %307 }
 0x147   :  { %v236_v55 = vadd.f32 1.0, %v308_v54 }
 0x149   :  { %309 = vrcp.f32 %v236_v55  ;;  %v248_v59 = vand.u32 2147483648, %v236_v55  ;;  %v246_v61 = vand.u32 2147483647, %v236_v55  ;;  %vm242_vm14 = vweird.f32 %v236_v55 }
 0x14b   :  { %v249_v63 = vor.u32 1.1754944e-38, %v248_v59  ;;  %vm247_vm0 = vcmp.eq.f32.partialorder %v246_v61, 8.507059e+37 }
 0x14f   :  { %v310_v56 = vpop.eup %309 }
 0x150   :  { %v238_v57 = vmul.f32 %v310_v56, %v236_v55  ;;  %vm243_vm13 = vweird.f32 %v310_v56 }
 0x151   :  { %vm244_vm15 = vmor %vm242_vm14, %vm243_vm13 }
 0x152   :  { %v239_v58 = vsub.f32 1.0, %v238_v57 }
 0x154   :  { %v240_v60 = vmul.f32 %v310_v56, %v239_v58 }
 0x156   :  { %v241_v62 = vadd.f32 %v310_v56, %v240_v60 }
 0x158   :  { %v245_v0 = vsel %vm244_vm15, %v310_v56, %v241_v62 }
 0x159   :  { %v250_v1 = vsel %vm247_vm0, %v249_v63, %v245_v0 }
 0x15a   :  { %252 = vst [vmem:[%s420_s3] sm:$0xff] %v250_v1 }

</bundles_post_ra>
